<compile_context>
chip_gen: v5e
topology: v5e:2x2
jax: 0.10.0
libtpu: 0.0.40
codegen_flags: <defaults>
</compile_context>

<pallas_src>
import jax
import jax.numpy as jnp
import numpy as np
from jax.experimental import pallas as pl
from jax.experimental.pallas import tpu as pltpu


def _round_up(n, m):
    return ((n + m - 1) // m) * m


# --------------------------------------------------------------------------- #
# Fused Pallas kernel: the whole ReLUKAN forward (all layers) in one call
# --------------------------------------------------------------------------- #
def _make_fused_relukan_kernel(num_layers, G):
    """Kernel factory.  Ref order: x, then per layer (plow, phigh, w, b), then out.

    Per-layer ref shapes (all f32, batch-on-lanes layout):
      plow, phigh : (D, 1)        flattened bump phases, D = G * I_pad, row p = j*I_pad + i
      w           : (O_pad, D)    conv weight, torch reshape quirk + r^2 already folded in
      b           : (O_pad, 1)
    """

    def kernel(*refs):
        x_ref = refs[0]
        out_ref = refs[-1]
        h = x_ref[...]                                        # (I0_pad, TB), f32
        for l in range(num_layers):
            plow_ref, phigh_ref, w_ref, b_ref = refs[1 + 4 * l: 5 + 4 * l]
            # Expand h (Ip, TB) -> (G*Ip, TB): row j*Ip + i holds feature i (tile-aligned copy).
            h_rep = jnp.concatenate([h] * G, axis=0)          # (D, TB)
            x1 = jnp.maximum(h_rep - plow_ref[...], 0.0)      # (D, TB)
            x2 = jnp.maximum(phigh_ref[...] - h_rep, 0.0)     # (D, TB)
            t = x1 * x2
            phi = t * t                                       # (D, TB); r^2 folded into w
            # One lane-dense matmul per layer over the full contraction D.
            h = jnp.dot(w_ref[...], phi,
                        preferred_element_type=jnp.float32) + b_ref[...]   # (O_pad, TB)
        out_ref[...] = h.astype(out_ref.dtype)

    return kernel


# --------------------------------------------------------------------------- #
# Parameter init (torch-shaped) and one-time layout preparation (hoisted)
# --------------------------------------------------------------------------- #
def init_relukan_params(key, width, g, k):
    G = g + k
    params = []
    for idx in range(len(width) - 1):
        I, O = width[idx], width[idx + 1]
        base = jnp.arange(-k, g, dtype=jnp.float32) / g                 # (G,)
        phase_low = jnp.broadcast_to(base, (I, G)).astype(jnp.float32)
        phase_high = phase_low + (k + 1) / g
        key, wk, bk = jax.random.split(key, 3)
        fan_in = 1 * G * I                                              # Conv2d(1, O, (G, I))
        bound = 1.0 / float(np.sqrt(fan_in))
        W = jax.random.uniform(wk, (O, G, I), jnp.float32, -bound, bound)
        b = jax.random.uniform(bk, (O,), jnp.float32, -bound, bound)
        params.append({"phase_low": phase_low, "phase_high": phase_high,
                       "W": W, "b": b})
    return params


def prepare_pallas_params(params, g, k):
    """One-time weight/phase layout prep (do NOT repeat per forward call).

    Torch quirk: the conv contracts W.reshape(O, G*I)[o, p] against phi.reshape(B, I*G)[b, p]
    over the raw flat index p; regrouping p as (i, j) (p = i*G + j) on the phi side means the
    matching weight is W.reshape(O, I, G) (raw reinterpretation).  The kernel's phi slab uses
    flat index q = j*I_pad + i, so we store w[o, q] = r^2 * W.reshape(O, I, G)[o, i, j],
    zero-padded to (O_pad, G*I_pad).  Phases are flattened the same way to (D, 1).
    """
    G = g + k
    r = 4.0 * g * g / ((k + 1) * (k + 1))
    r2 = r * r
    prepped = []
    for p in params:
        I, _ = p["phase_low"].shape
        O = p["W"].shape[0]
        Ip = _round_up(I, 8)
        Op = _round_up(O, 8)
        D = G * Ip
        plow = jnp.pad(jnp.transpose(p["phase_low"]), ((0, 0), (0, Ip - I)))   # (G, Ip)
        phigh = jnp.pad(jnp.transpose(p["phase_high"]), ((0, 0), (0, Ip - I)))
        plow = plow.reshape(D, 1).astype(jnp.float32)
        phigh = phigh.reshape(D, 1).astype(jnp.float32)
        wq = p["W"].reshape(O, I, G)                    # raw flat-index reinterpretation
        w_t = jnp.transpose(wq, (0, 2, 1))              # (O, G, I) with [o, j, i]
        w_t = jnp.pad(w_t, ((0, Op - O), (0, 0), (0, Ip - I)))                 # (Op, G, Ip)
        w_flat = (w_t * r2).reshape(Op, D).astype(jnp.float32)                 # r^2 folded in
        b = jnp.pad(p["b"], (0, Op - O)).reshape(Op, 1).astype(jnp.float32)
        prepped.append((plow, phigh, w_flat, b))
    return prepped


# --------------------------------------------------------------------------- #
# Forward pass (fused Pallas) and a torch-faithful pure-JAX reference
# --------------------------------------------------------------------------- #
def _choose_batch_tile(B, block_b=512, lane=128):
    # TB goes on the LANE axis: must be a multiple of 128 or equal to B.
    if B <= lane:
        return B
    tb = min(block_b, (B + 1) // 2)        # aim for >= 2 grid steps (v7x: 2 TensorCores)
    tb = max(lane, (tb // lane) * lane)
    return tb


def relukan_forward_pallas(prepped, x, *, g, k, out_dim, block_b=512):
    # x: (B, width[0], 1) -> (B, width[-1], 1)
    G = g + k
    B = x.shape[0]
    I0 = x.shape[1]
    D0 = prepped[0][0].shape[0]            # plow of layer 0: (G * I0_pad, 1)
    I0p = D0 // G
    Op_last = prepped[-1][2].shape[0]      # w of last layer: (O_last_pad, D)
    num_layers = len(prepped)

    # Batch-on-lanes: present the input as (I0_pad, B), zero-padding the feature rows.
    h0 = jnp.transpose(x[..., 0].astype(jnp.float32))           # (I0, B)
    if I0p != I0:
        h0 = jnp.pad(h0, ((0, I0p - I0), (0, 0)))

    TB = _choose_batch_tile(B, block_b)
    grid = (pl.cdiv(B, TB),)

    def _full_spec(arr):
        return pl.BlockSpec(arr.shape, lambda i, _nd=arr.ndim: (0,) * _nd)

    in_specs = [pl.BlockSpec((I0p, TB), lambda i: (0, i))]
    flat_inputs = [h0]
    for layer in prepped:
        for arr in layer:
            in_specs.append(_full_spec(arr))
            flat_inputs.append(arr)

    out2d = pl.pallas_call(
        _make_fused_relukan_kernel(num_layers, G),
        out_shape=jax.ShapeDtypeStruct((Op_last, B), jnp.float32),
        grid=grid,
        in_specs=in_specs,
        out_specs=pl.BlockSpec((Op_last, TB), lambda i: (0, i)),
        compiler_params=pltpu.CompilerParams(dimension_semantics=("parallel",)),
    )(*flat_inputs)

    # Drop the feature padding and transpose back to the torch (B, O, 1) layout.
    return jnp.transpose(out2d[:out_dim, :])[:, :, None]


def relukan_forward_reference(params, x, g, k):
    # Follows the PyTorch code path exactly (including the raw reshape quirk).
    r = 4.0 * g * g / ((k + 1) * (k + 1))
    G = g + k
    for p in params:
        x1 = jnp.maximum(x - p["phase_low"][None], 0.0)             # (B, I, G)
        x2 = jnp.maximum(p["phase_high"][None] - x, 0.0)
        phi = x1 * x2 * r
        phi = phi * phi
        B = phi.shape[0]
        I = p["phase_low"].shape[0]
        phi = phi.reshape(B, 1, G, I)                               # memory reinterpretation
        y = jnp.einsum("bcji,ocji->bo", phi, p["W"][:, None]) + p["b"]
        x = y[:, :, None]
    return x


# --------------------------------------------------------------------------- #
if __name__ == "__main__":
    width = [4, 16, 8]       # ReLUKAN(width=[4, 16, 8], grid=5, k=3)
    g, k = 5, 3
    B = 8

    key = jax.random.PRNGKey(0)
    pkey, xkey = jax.random.split(key)
    params = init_relukan_params(pkey, width, g, k)
    prepped = prepare_pallas_params(params, g, k)                   # one-time layout prep
    x = jax.random.uniform(xkey, (B, width[0], 1), jnp.float32)

    fwd = jax.jit(relukan_forward_pallas,
                  static_argnames=("g", "k", "out_dim", "block_b"))
    out = jax.block_until_ready(fwd(prepped, x, g=g, k=k, out_dim=width[-1]))

    ref = jax.block_until_ready(relukan_forward_reference(params, x, g, k))
    assert out.shape == (B, width[-1], 1), out.shape
    np.testing.assert_allclose(np.asarray(out), np.asarray(ref), rtol=1e-4, atol=1e-5)

    print("KERNEL_OK")
</pallas_src>

<mosaic_0001>
module attributes {stable_mosaic.version = 11 : i64} {
  func.func @kernel(%arg0: i32, %arg1: memref<8x8xf32, #tpu.memory_space<vmem>>, %arg2: memref<64x1xf32, #tpu.memory_space<vmem>>, %arg3: memref<64x1xf32, #tpu.memory_space<vmem>>, %arg4: memref<16x64xf32, #tpu.memory_space<vmem>>, %arg5: memref<16x1xf32, #tpu.memory_space<vmem>>, %arg6: memref<128x1xf32, #tpu.memory_space<vmem>>, %arg7: memref<128x1xf32, #tpu.memory_space<vmem>>, %arg8: memref<8x128xf32, #tpu.memory_space<vmem>>, %arg9: memref<8x1xf32, #tpu.memory_space<vmem>>, %arg10: memref<8x8xf32, #tpu.memory_space<vmem>>) attributes {dimension_semantics = [#tpu.dimension_semantics<parallel>], iteration_bounds = array<i64: 1>, scalar_prefetch = 0 : i64, scratch_operands = 0 : i64, tpu.core_type = #tpu.core_type<tc>, window_params = [{transform_indices = @transform_0, window_bounds = array<i64: 8, 8>}, {pipeline_mode = #tpu.pipeline_mode<synchronous>, transform_indices = @transform_1, window_bounds = array<i64: 64, 1>}, {pipeline_mode = #tpu.pipeline_mode<synchronous>, transform_indices = @transform_2, window_bounds = array<i64: 64, 1>}, {pipeline_mode = #tpu.pipeline_mode<synchronous>, transform_indices = @transform_3, window_bounds = array<i64: 16, 64>}, {pipeline_mode = #tpu.pipeline_mode<synchronous>, transform_indices = @transform_4, window_bounds = array<i64: 16, 1>}, {pipeline_mode = #tpu.pipeline_mode<synchronous>, transform_indices = @transform_5, window_bounds = array<i64: 128, 1>}, {pipeline_mode = #tpu.pipeline_mode<synchronous>, transform_indices = @transform_6, window_bounds = array<i64: 128, 1>}, {pipeline_mode = #tpu.pipeline_mode<synchronous>, transform_indices = @transform_7, window_bounds = array<i64: 8, 128>}, {pipeline_mode = #tpu.pipeline_mode<synchronous>, transform_indices = @transform_8, window_bounds = array<i64: 8, 1>}, {transform_indices = @transform_9, window_bounds = array<i64: 8, 8>}]} {
    %c0 = arith.constant 0 : index
    %c0_0 = arith.constant 0 : index
    %0 = vector.load %arg1[%c0, %c0_0] : memref<8x8xf32, #tpu.memory_space<vmem>>, vector<8x8xf32>
    %1 = tpu.concatenate %0, %0, %0, %0, %0, %0, %0, %0 in 0 : vector<8x8xf32>, vector<8x8xf32>, vector<8x8xf32>, vector<8x8xf32>, vector<8x8xf32>, vector<8x8xf32>, vector<8x8xf32>, vector<8x8xf32> -> vector<64x8xf32>
    %c0_1 = arith.constant 0 : index
    %c0_2 = arith.constant 0 : index
    %2 = vector.load %arg2[%c0_1, %c0_2] : memref<64x1xf32, #tpu.memory_space<vmem>>, vector<64x1xf32>
    %3 = vector.broadcast %2 : vector<64x1xf32> to vector<64x8xf32>
    %4 = arith.subf %1, %3 : vector<64x8xf32>
    %cst = arith.constant 0.000000e+00 : f32
    %5 = vector.broadcast %cst : f32 to vector<64x8xf32>
    %6 = arith.maximumf %4, %5 : vector<64x8xf32>
    %c0_3 = arith.constant 0 : index
    %c0_4 = arith.constant 0 : index
    %7 = vector.load %arg3[%c0_3, %c0_4] : memref<64x1xf32, #tpu.memory_space<vmem>>, vector<64x1xf32>
    %8 = vector.broadcast %7 : vector<64x1xf32> to vector<64x8xf32>
    %9 = arith.subf %8, %1 : vector<64x8xf32>
    %cst_5 = arith.constant 0.000000e+00 : f32
    %10 = vector.broadcast %cst_5 : f32 to vector<64x8xf32>
    %11 = arith.maximumf %9, %10 : vector<64x8xf32>
    %12 = arith.mulf %6, %11 : vector<64x8xf32>
    %13 = arith.mulf %12, %12 : vector<64x8xf32>
    %c0_6 = arith.constant 0 : index
    %c0_7 = arith.constant 0 : index
    %14 = vector.load %arg4[%c0_6, %c0_7] : memref<16x64xf32, #tpu.memory_space<vmem>>, vector<16x64xf32>
    %cst_8 = arith.constant dense<0.000000e+00> : vector<16x8xf32>
    %15 = tpu.matmul %14, %13, %cst_8 {dimension_numbers = #tpu.dot_dimension_numbers<[1], [0], [0], [1], [0, 0, 1, 1], [], []>} : vector<16x64xf32>, vector<64x8xf32>, vector<16x8xf32> -> vector<16x8xf32>
    %c0_9 = arith.constant 0 : index
    %c0_10 = arith.constant 0 : index
    %16 = vector.load %arg5[%c0_9, %c0_10] : memref<16x1xf32, #tpu.memory_space<vmem>>, vector<16x1xf32>
    %17 = vector.broadcast %16 : vector<16x1xf32> to vector<16x8xf32>
    %18 = arith.addf %15, %17 : vector<16x8xf32>
    %19 = tpu.concatenate %18, %18, %18, %18, %18, %18, %18, %18 in 0 : vector<16x8xf32>, vector<16x8xf32>, vector<16x8xf32>, vector<16x8xf32>, vector<16x8xf32>, vector<16x8xf32>, vector<16x8xf32>, vector<16x8xf32> -> vector<128x8xf32>
    %c0_11 = arith.constant 0 : index
    %c0_12 = arith.constant 0 : index
    %20 = vector.load %arg6[%c0_11, %c0_12] : memref<128x1xf32, #tpu.memory_space<vmem>>, vector<128x1xf32>
    %21 = vector.broadcast %20 : vector<128x1xf32> to vector<128x8xf32>
    %22 = arith.subf %19, %21 : vector<128x8xf32>
    %cst_13 = arith.constant 0.000000e+00 : f32
    %23 = vector.broadcast %cst_13 : f32 to vector<128x8xf32>
    %24 = arith.maximumf %22, %23 : vector<128x8xf32>
    %c0_14 = arith.constant 0 : index
    %c0_15 = arith.constant 0 : index
    %25 = vector.load %arg7[%c0_14, %c0_15] : memref<128x1xf32, #tpu.memory_space<vmem>>, vector<128x1xf32>
    %26 = vector.broadcast %25 : vector<128x1xf32> to vector<128x8xf32>
    %27 = arith.subf %26, %19 : vector<128x8xf32>
    %cst_16 = arith.constant 0.000000e+00 : f32
    %28 = vector.broadcast %cst_16 : f32 to vector<128x8xf32>
    %29 = arith.maximumf %27, %28 : vector<128x8xf32>
    %30 = arith.mulf %24, %29 : vector<128x8xf32>
    %31 = arith.mulf %30, %30 : vector<128x8xf32>
    %c0_17 = arith.constant 0 : index
    %c0_18 = arith.constant 0 : index
    %32 = vector.load %arg8[%c0_17, %c0_18] : memref<8x128xf32, #tpu.memory_space<vmem>>, vector<8x128xf32>
    %cst_19 = arith.constant dense<0.000000e+00> : vector<8x8xf32>
    %33 = tpu.matmul %32, %31, %cst_19 {dimension_numbers = #tpu.dot_dimension_numbers<[1], [0], [0], [1], [0, 0, 1, 1], [], []>} : vector<8x128xf32>, vector<128x8xf32>, vector<8x8xf32> -> vector<8x8xf32>
    %c0_20 = arith.constant 0 : index
    %c0_21 = arith.constant 0 : index
    %34 = vector.load %arg9[%c0_20, %c0_21] : memref<8x1xf32, #tpu.memory_space<vmem>>, vector<8x1xf32>
    %35 = vector.broadcast %34 : vector<8x1xf32> to vector<8x8xf32>
    %36 = arith.addf %33, %35 : vector<8x8xf32>
    %c0_22 = arith.constant 0 : index
    %c0_23 = arith.constant 0 : index
    %37 = vector.load %arg10[%c0_22, %c0_23] : memref<8x8xf32, #tpu.memory_space<vmem>>, vector<8x8xf32>
    tpu.vector_store %arg10[%c0_22, %c0_23], %36 {strides = array<i32>} : memref<8x8xf32, #tpu.memory_space<vmem>>, vector<8x8xf32>,
    return
  }
  func.func @transform_0(%arg0: i32) -> (i32, i32) {
    %c0_i32 = arith.constant 0 : i32
    %c0_i32_0 = arith.constant 0 : i32
    return %c0_i32, %arg0 : i32, i32
  }
  func.func @transform_1(%arg0: i32) -> (i32, i32) {
    %c0_i32 = arith.constant 0 : i32
    %c0_i32_0 = arith.constant 0 : i32
    %c0_i32_1 = arith.constant 0 : i32
    return %c0_i32, %c0_i32_0 : i32, i32
  }
  func.func @transform_2(%arg0: i32) -> (i32, i32) {
    %c0_i32 = arith.constant 0 : i32
    %c0_i32_0 = arith.constant 0 : i32
    %c0_i32_1 = arith.constant 0 : i32
    return %c0_i32, %c0_i32_0 : i32, i32
  }
  func.func @transform_3(%arg0: i32) -> (i32, i32) {
    %c0_i32 = arith.constant 0 : i32
    %c0_i32_0 = arith.constant 0 : i32
    %c0_i32_1 = arith.constant 0 : i32
    return %c0_i32, %c0_i32_0 : i32, i32
  }
  func.func @transform_4(%arg0: i32) -> (i32, i32) {
    %c0_i32 = arith.constant 0 : i32
    %c0_i32_0 = arith.constant 0 : i32
    %c0_i32_1 = arith.constant 0 : i32
    return %c0_i32, %c0_i32_0 : i32, i32
  }
  func.func @transform_5(%arg0: i32) -> (i32, i32) {
    %c0_i32 = arith.constant 0 : i32
    %c0_i32_0 = arith.constant 0 : i32
    %c0_i32_1 = arith.constant 0 : i32
    return %c0_i32, %c0_i32_0 : i32, i32
  }
  func.func @transform_6(%arg0: i32) -> (i32, i32) {
    %c0_i32 = arith.constant 0 : i32
    %c0_i32_0 = arith.constant 0 : i32
    %c0_i32_1 = arith.constant 0 : i32
    return %c0_i32, %c0_i32_0 : i32, i32
  }
  func.func @transform_7(%arg0: i32) -> (i32, i32) {
    %c0_i32 = arith.constant 0 : i32
    %c0_i32_0 = arith.constant 0 : i32
    %c0_i32_1 = arith.constant 0 : i32
    return %c0_i32, %c0_i32_0 : i32, i32
  }
  func.func @transform_8(%arg0: i32) -> (i32, i32) {
    %c0_i32 = arith.constant 0 : i32
    %c0_i32_0 = arith.constant 0 : i32
    %c0_i32_1 = arith.constant 0 : i32
    return %c0_i32, %c0_i32_0 : i32, i32
  }
  func.func @transform_9(%arg0: i32) -> (i32, i32) {
    %c0_i32 = arith.constant 0 : i32
    %c0_i32_0 = arith.constant 0 : i32
    return %c0_i32, %arg0 : i32, i32
  }
}

</mosaic_0001>

<bundles_post_ra>
// kernel: relukan_forward_pallas.1
= control target key start
LH: loop header
LB: loop body
LE: loop exit
PB: predicated region body
PF: predicated region fallthrough
CT: control target
= control target key end

     0   :  { %v548_v0 = vmov 0   ;;  %vm191_vm0 = vcmask 523264   ;;  %vm536_vm1 = vcmask 64512   ;;  %s857_s1 = inlined_call_operand.vmem [shape: f32[64,1], index: 1, kind: input, shape index: {}]   ;;  %s858_s2 = inlined_call_operand.vmem [shape: f32[64,1], index: 2, kind: input, shape index: {}]   ;;  %s859_s4 = inlined_call_operand.vmem [shape: f32[16,1], index: 4, kind: input, shape index: {}]   ;;  %s860_s6 = inlined_call_operand.vmem [shape: f32[128,1], index: 6, kind: input, shape index: {}]   ;;  %s861_s5 = inlined_call_operand.vmem [shape: f32[128,1], index: 5, kind: input, shape index: {}]   ;;  %s862_s0 = inlined_call_operand.vmem [shape: f32[8,8], index: 0, kind: input, shape index: {}]   ;;  %s863_s8 = inlined_call_operand.vmem [shape: f32[8,1], index: 8, kind: input, shape index: {}]   ;;  %s864_s3 = inlined_call_operand.vmem [shape: f32[16,64], index: 3, kind: input, shape index: {}]   ;;  %s865_s7 = inlined_call_operand.vmem [shape: f32[8,128], index: 7, kind: input, shape index: {}]   ;;  %s866_s9 = inlined_call_operand.vmem [shape: f32[8,8], index: 9, kind: output, shape index: {}]  }
   0x1   :  { %547 = vset.pattern.permute.xlu2 %v548_v0  ;;  %546 = vset.pattern.permute.xlu1 %v548_v0  ;;  %v40_v1 = vld [vmem:[%s857_s1 + $0x38] sm:$0xff]  ;;  %v39_v2 = vld [vmem:[%s857_s1 + $0x30] sm:$0xff]  ;;  %v38_v3 = vld [vmem:[%s857_s1 + $0x28] sm:$0xff] }
   0x2   :  { %545 = vset.pattern.permute.xlu0 %v548_v0  ;;  %73 = vperm.xlu1 %546, %v39_v2   ;;  %v103_v4 = vld [vmem:[%s858_s2 + $0x30] sm:$0xff]  ;;  %v104_v5 = vld [vmem:[%s858_s2 + $0x38] sm:$0xff]  ;;  %v102_v6 = vld [vmem:[%s858_s2 + $0x28] sm:$0xff] }
   0x3   :  { %78 = vperm.xlu0 %545, %v40_v1   ;;  %68 = vperm.xlu2 %547, %v38_v3   ;;  %v101_v7 = vld [vmem:[%s858_s2 + $0x20] sm:$0xff]  ;;  %v36_v9 = vld [vmem:[%s857_s1 + $0x18] sm:$0xff]  ;;  %v35_v10 = vld [vmem:[%s857_s1 + $0x10] sm:$0xff] }
   0x4   :  { %v37_v8 = vld [vmem:[%s857_s1 + $0x20] sm:$0xff]  ;;  %v100_v11 = vld [vmem:[%s858_s2 + $0x18] sm:$0xff]  ;;  %v99_v12 = vld [vmem:[%s858_s2 + $0x10] sm:$0xff] }
   0x5   :  { %v98_v13 = vld [vmem:[%s858_s2 + $0x8] sm:$0xff]  ;;  %v33_v15 = vld [vmem:[%s857_s1] sm:$0xff]  ;;  %v364_v19 = vld [vmem:[%s860_s6 + $0x78] sm:$0xff] }
   0x6   :  { %v34_v14 = vld [vmem:[%s857_s1 + $0x8] sm:$0xff]  ;;  %v179_v16 = vld [vmem:[%s859_s4] sm:$0xff]  ;;  %v236_v20 = vld [vmem:[%s861_s5 + $0x78] sm:$0xff] }
   0x7   :  { %v97_v17 = vld [vmem:[%s858_s2] sm:$0xff]  ;;  %v180_v18 = vld [vmem:[%s859_s4 + $0x8] sm:$0xff]  ;;  %v235_v21 = vld [vmem:[%s861_s5 + $0x70] sm:$0xff] }
   0x8   :  { %v234_v22 = vld [vmem:[%s861_s5 + $0x68] sm:$0xff]  ;;  %v363_v23 = vld [vmem:[%s860_s6 + $0x70] sm:$0xff]  ;;  %v361_v25 = vld [vmem:[%s860_s6 + $0x60] sm:$0xff] }
   0x9   :  { %v362_v24 = vld [vmem:[%s860_s6 + $0x68] sm:$0xff]  ;;  %v233_v26 = vld [vmem:[%s861_s5 + $0x60] sm:$0xff]  ;;  %v232_v27 = vld [vmem:[%s861_s5 + $0x58] sm:$0xff] }
   0xa   :  { %137 = vperm.xlu1 %546, %v103_v4   ;;  %v231_v28 = vld [vmem:[%s861_s5 + $0x50] sm:$0xff]  ;;  %v360_v29 = vld [vmem:[%s860_s6 + $0x58] sm:$0xff]  ;;  %v358_v31 = vld [vmem:[%s860_s6 + $0x48] sm:$0xff] }
   0xb   :  { %142 = vperm.xlu0 %545, %v104_v5   ;;  %132 = vperm.xlu2 %547, %v102_v6   ;;  %v359_v30 = vld [vmem:[%s860_s6 + $0x50] sm:$0xff]  ;;  %v230_v32 = vld [vmem:[%s861_s5 + $0x48] sm:$0xff]  ;;  %v229_v33 = vld [vmem:[%s861_s5 + $0x40] sm:$0xff] }
   0xc   :  { %v228_v34 = vld [vmem:[%s861_s5 + $0x38] sm:$0xff]  ;;  %v357_v35 = vld [vmem:[%s860_s6 + $0x40] sm:$0xff]  ;;  %v355_v37 = vld [vmem:[%s860_s6 + $0x30] sm:$0xff] }
   0xd   :  { %v356_v36 = vld [vmem:[%s860_s6 + $0x38] sm:$0xff]  ;;  %v227_v38 = vld [vmem:[%s861_s5 + $0x30] sm:$0xff]  ;;  %v226_v39 = vld [vmem:[%s861_s5 + $0x28] sm:$0xff] }
   0xe   :  { %v225_v40 = vld [vmem:[%s861_s5 + $0x20] sm:$0xff]  ;;  %v354_v41 = vld [vmem:[%s860_s6 + $0x28] sm:$0xff]  ;;  %v352_v44 = vld [vmem:[%s860_s6 + $0x18] sm:$0xff] }
   0xf   :  { %v353_v42 = vld [vmem:[%s860_s6 + $0x20] sm:$0xff]  ;;  %v224_v45 = vld [vmem:[%s861_s5 + $0x18] sm:$0xff]  ;;  %v223_v46 = vld [vmem:[%s861_s5 + $0x10] sm:$0xff] }
  0x10   :  { %v222_v50 = vld [vmem:[%s861_s5 + $0x8] sm:$0xff]  ;;  %v351_v51 = vld [vmem:[%s860_s6 + $0x10] sm:$0xff]  ;;  %v746_v53 = vld [vmem:[%s862_s0] sm:$0xff] }
  0x11   :  { %v350_v52 = vld [vmem:[%s860_s6 + $0x8] sm:$0xff]  ;;  %v349_v0 = vld [vmem:[%s860_s6] sm:$0xff] }
  0x12   :  { %127 = vperm.xlu1 %546, %v101_v7   ;;  %v221_v5 = vld [vmem:[%s861_s5] sm:$0xff] }
  0x13   :  { %63 = vperm.xlu0 %545, %v37_v8   ;;  %58 = vperm.xlu2 %547, %v36_v9   ;;  %v510_v6 = vld [vmem:[%s863_s8] sm:$0xff] }
  0x1a   :  { %53 = vperm.xlu1 %546, %v35_v10  }
  0x1b   :  { %122 = vperm.xlu0 %545, %v100_v11   ;;  %117 = vperm.xlu2 %547, %v99_v12  }
  0x22   :  { %112 = vperm.xlu1 %546, %v98_v13  }
  0x23   :  { %48 = vperm.xlu0 %545, %v34_v14   ;;  %43 = vperm.xlu2 %547, %v33_v15  }
  0x2a   :  { %183 = vperm.xlu1 %546, %v179_v16  }
  0x2b   :  { %107 = vperm.xlu0 %545, %v97_v17   ;;  %188 = vperm.xlu2 %547, %v180_v18  }
  0x32   :  { %442 = vperm.xlu1 %546, %v364_v19  }
  0x33   :  { %314 = vperm.xlu0 %545, %v236_v20   ;;  %309 = vperm.xlu2 %547, %v235_v21  }
  0x3a   :  { %304 = vperm.xlu1 %546, %v234_v22  }
  0x3b   :  { %437 = vperm.xlu0 %545, %v363_v23   ;;  %432 = vperm.xlu2 %547, %v362_v24  }
  0x42   :  { %427 = vperm.xlu1 %546, %v361_v25  }
  0x43   :  { %299 = vperm.xlu0 %545, %v233_v26   ;;  %294 = vperm.xlu2 %547, %v232_v27  }
  0x4a   :  { %289 = vperm.xlu1 %546, %v231_v28  }
  0x4b   :  { %422 = vperm.xlu0 %545, %v360_v29   ;;  %417 = vperm.xlu2 %547, %v359_v30  }
  0x52   :  { %412 = vperm.xlu1 %546, %v358_v31  }
  0x53   :  { %284 = vperm.xlu0 %545, %v230_v32   ;;  %279 = vperm.xlu2 %547, %v229_v33  }
  0x5a   :  { %274 = vperm.xlu1 %546, %v228_v34  }
  0x5b   :  { %407 = vperm.xlu0 %545, %v357_v35   ;;  %402 = vperm.xlu2 %547, %v356_v36  }
  0x5d   :  { %v69_v43 = vpop.permute.xlu2 %68 }
  0x5e   :  { %v86_v54 = vsub.f32 %v746_v53, %v69_v43 }
  0x60   :  { %v94_v62 = vmax.f32 %v86_v54, 0.0  ;;  %v177_v54 = vld [vmem:[%s864_s3] sm:$0xff] }
  0x62   :  { %397 = vperm.xlu1 %546, %v355_v37  }
  0x63   :  { %269 = vperm.xlu0 %545, %v227_v38   ;;  %264 = vperm.xlu2 %547, %v226_v39  }
  0x65   :  { %v133_v49 = vpop.permute.xlu2 %132 }
  0x66   :  { %v150_v55 = vsub.f32 %v133_v49, %v746_v53 }
  0x68   :  { %v158_v1 = vmax.f32 %v150_v55, 0.0  ;;  %v178_v55 = vld [vmem:[%s864_s3 + $0x8] sm:$0xff] }
  0x6a   :  { %259 = vperm.xlu1 %546, %v225_v40   ;;  %v166_v12 = vmul.f32 %v158_v1, %v94_v62 }
  0x6b   :  { %392 = vperm.xlu0 %545, %v354_v41   ;;  %387 = vperm.xlu2 %547, %v353_v42  }
  0x6c   :  { %v174_v19 = vmul.f32 %v166_v12, %v166_v12 }
  0x6d   :  { %v59_v7 = vpop.permute.xlu2 %58 }
  0x6e   :  { %v84_v22 = vsub.f32 %v746_v53, %v59_v7 }
  0x70   :  { %v92_v30 = vmax.f32 %v84_v22, 0.0 }
  0x72   :  { %382 = vperm.xlu1 %546, %v352_v44  }
  0x73   :  { %254 = vperm.xlu0 %545, %v224_v45   ;;  %249 = vperm.xlu2 %547, %v223_v46  }
  0x74   :  { %v74_v47 = vpop.permute.xlu1 %73 }
  0x75   :  { %v79_v48 = vpop.permute.xlu0 %78  ;;  %v87_v57 = vsub.f32 %v746_v53, %v74_v47  ;;  %v118_v21 = vpop.permute.xlu2 %117 }
  0x76   :  { %v88_v56 = vsub.f32 %v746_v53, %v79_v48  ;;  %v147_v23 = vsub.f32 %v118_v21, %v746_v53 }
  0x77   :  { %v95_v3 = vmax.f32 %v87_v57, 0.0 }
  0x78   :  { %v96_v2 = vmax.f32 %v88_v56, 0.0  ;;  %v155_v31 = vmax.f32 %v147_v23, 0.0 }
  0x7a   :  { %244 = vperm.xlu1 %546, %v222_v50  }
  0x7b   :  { %377 = vperm.xlu0 %545, %v351_v51   ;;  %372 = vperm.xlu2 %547, %v350_v52  }
  0x7c   :  { %v138_v58 = vpop.permute.xlu1 %137 }
  0x7d   :  { %v143_v59 = vpop.permute.xlu0 %142  ;;  %v151_v60 = vsub.f32 %v138_v58, %v746_v53  ;;  %v44_v43 = vpop.permute.xlu2 %43 }
  0x7e   :  { %v152_v61 = vsub.f32 %v143_v59, %v746_v53  ;;  %v81_v45 = vsub.f32 %v746_v53, %v44_v43 }
  0x7f   :  { %v159_v63 = vmax.f32 %v151_v60, 0.0 }
  0x80   :  { %v160_v4 = vmax.f32 %v152_v61, 0.0  ;;  %v89_v49 = vmax.f32 %v81_v45, 0.0 }
  0x81   :  { %v167_v9 = vmul.f32 %v159_v63, %v95_v3 }
  0x82   :  { %367 = vperm.xlu1 %546, %v349_v0   ;;  %v168_v8 = vmul.f32 %v160_v4, %v96_v2 }
  0x83   :  { %239 = vperm.xlu0 %545, %v221_v5   ;;  %513 = vperm.xlu2 %547, %v510_v6   ;;  %v175_v16 = vmul.f32 %v167_v9, %v167_v9 }
  0x84   :  { %v128_v10 = vpop.permute.xlu1 %127  ;;  %v176_v11 = vmul.f32 %v168_v8, %v168_v8 }
  0x85   :  { %v149_v13 = vsub.f32 %v128_v10, %v746_v53  ;;  %v64_v14 = vpop.permute.xlu0 %63  ;;  %v189_v57 = vpop.permute.xlu2 %188 }
  0x86   :  { %v85_v15 = vsub.f32 %v746_v53, %v64_v14  ;;  %206 = vmatpush.msra.mxu0 %v176_v11 }
  0x87   :  { %v157_v17 = vmax.f32 %v149_v13, 0.0 }
  0x88   :  { %v93_v18 = vmax.f32 %v85_v15, 0.0  ;;  %207 = vmatpush.msra.mxu0 %v175_v16 }
  0x8a   :  { %208 = vmatpush.msra.mxu0 %v174_v19  ;;  %v165_v20 = vmul.f32 %v157_v17, %v93_v18 }
  0x8c   :  { %v54_v24 = vpop.permute.xlu1 %53  ;;  %v173_v25 = vmul.f32 %v165_v20, %v165_v20 }
  0x8d   :  { %v123_v26 = vpop.permute.xlu0 %122  ;;  %v83_v27 = vsub.f32 %v746_v53, %v54_v24  ;;  %v310_v59 = vpop.permute.xlu2 %309 }
  0x8e   :  { %v148_v28 = vsub.f32 %v123_v26, %v746_v53  ;;  %209 = vmatpush.msra.mxu0 %v173_v25 }
  0x8f   :  { %v91_v29 = vmax.f32 %v83_v27, 0.0 }
  0x90   :  { %v156_v32 = vmax.f32 %v148_v28, 0.0 }
  0x91   :  { %v163_v34 = vmul.f32 %v155_v31, %v91_v29 }
  0x92   :  { %v164_v33 = vmul.f32 %v156_v32, %v92_v30 }
  0x93   :  { %v171_v40 = vmul.f32 %v163_v34, %v163_v34 }
  0x94   :  { %v113_v35 = vpop.permute.xlu1 %112  ;;  %v172_v36 = vmul.f32 %v164_v33, %v164_v33 }
  0x95   :  { %v146_v37 = vsub.f32 %v113_v35, %v746_v53  ;;  %v49_v38 = vpop.permute.xlu0 %48  ;;  %v433_v62 = vpop.permute.xlu2 %432 }
  0x96   :  { %v82_v39 = vsub.f32 %v746_v53, %v49_v38  ;;  %210 = vmatpush.msra.mxu0 %v172_v36 }
  0x97   :  { %v154_v41 = vmax.f32 %v146_v37, 0.0 }
  0x98   :  { %v90_v42 = vmax.f32 %v82_v39, 0.0  ;;  %211 = vmatpush.msra.mxu0 %v171_v40 }
  0x9a   :  { %v162_v44 = vmul.f32 %v154_v41, %v90_v42 }
  0x9c   :  { %v170_v46 = vmul.f32 %v162_v44, %v162_v44  ;;  %v184_v56 = vpop.permute.xlu1 %183 }
  0x9d   :  { %v108_v47 = vpop.permute.xlu0 %107  ;;  %v295_v1 = vpop.permute.xlu2 %294 }
  0x9e   :  { %v145_v48 = vsub.f32 %v108_v47, %v746_v53  ;;  %212 = vmatpush.msra.mxu0 %v170_v46 }
  0xa0   :  { %v153_v50 = vmax.f32 %v145_v48, 0.0 }
  0xa2   :  { %v161_v51 = vmul.f32 %v153_v50, %v89_v49 }
  0xa4   :  { %v169_v52 = vmul.f32 %v161_v51, %v161_v51  ;;  %v443_v53 = vpop.permute.xlu1 %442 }
  0xa5   :  { %v315_v58 = vpop.permute.xlu0 %314  ;;  %v418_v4 = vpop.permute.xlu2 %417 }
  0xa6   :  { %213 = vmatpush.msra.mxu0 %v169_v52 }
  0xa7   :  { %542 = vmatmul.msk.f32.vlgmr.msra.gmra.mxu0 %vm191_vm0, %v177_v54 }
  0xac   :  { %v305_v60 = vpop.permute.xlu1 %304 }
  0xad   :  { %v438_v61 = vpop.permute.xlu0 %437  ;;  %v779_v7 = vpop.permute.xlu2 %279 }
  0xaf   :  { %543 = vmatmul.msk.f32.gmra.mxu0 %vm191_vm0, %v178_v55 }
  0xb4   :  { %v428_v63 = vpop.permute.xlu1 %427 }
  0xb5   :  { %v300_v0 = vpop.permute.xlu0 %299  ;;  %v785_v10 = vpop.permute.xlu2 %402 }
  0xbc   :  { %v290_v2 = vpop.permute.xlu1 %289 }
  0xbd   :  { %v423_v3 = vpop.permute.xlu0 %422  ;;  %v791_v14 = vpop.permute.xlu2 %264 }
  0xc4   :  { %v413_v5 = vpop.permute.xlu1 %412 }
  0xc5   :  { %v285_v6 = vpop.permute.xlu0 %284  ;;  %v809_v30 = vpop.permute.xlu2 %387 }
  0xcc   :  { %v781_v8 = vpop.permute.xlu1 %274 }
  0xcd   :  { %v783_v9 = vpop.permute.xlu0 %407 }
  0xd4   :  { %v787_v11 = vpop.permute.xlu1 %397 }
  0xd5   :  { %v789_v12 = vpop.permute.xlu0 %269 }
  0xdc   :  { %v795_v16 = vpop.permute.xlu1 %259 }
  0xdd   :  { %v797_v17 = vpop.permute.xlu0 %392 }
  0xe4   :  { %v813_v37 = vpop.permute.xlu1 %382 }
  0xe5   :  { %v815_v38 = vpop.permute.xlu0 %254 }
 0x124   :  { %v215_v13 = vpop.f32.mrf.mxu0 }
 0x125   :  { %v793_v15 = vadd.f32 %v215_v13, %v184_v56 }
 0x127   :  { %v331_v18 = vsub.f32 %v793_v15, %v310_v59  ;;  %v459_v19 = vsub.f32 %v438_v61, %v793_v15  ;;  %v329_v24 = vsub.f32 %v793_v15, %v300_v0  ;;  %v457_v25 = vsub.f32 %v428_v63, %v793_v15  ;;  %v250_v63 = vpop.permute.xlu2 %249 }
 0x128   :  { %v327_v39 = vsub.f32 %v793_v15, %v290_v2  ;;  %v455_v40 = vsub.f32 %v418_v4, %v793_v15  ;;  %v325_v51 = vsub.f32 %v793_v15, %v779_v7  ;;  %v453_v52 = vsub.f32 %v783_v9, %v793_v15  ;;  %v378_v7 = vpop.permute.xlu0 %377 }
 0x129   :  { %v347_v22 = vmax.f32 %v331_v18, 0.0  ;;  %v475_v23 = vmax.f32 %v459_v19, 0.0  ;;  %v345_v43 = vmax.f32 %v329_v24, 0.0  ;;  %v473_v44 = vmax.f32 %v457_v25, 0.0 }
 0x12a   :  { %v343_v56 = vmax.f32 %v327_v39, 0.0  ;;  %v323_v0 = vsub.f32 %v793_v15, %v789_v12  ;;  %v341_v4 = vmax.f32 %v325_v51, 0.0 }
 0x12b   :  { %v491_v42 = vmul.f32 %v475_v23, %v347_v22  ;;  %v489_v55 = vmul.f32 %v473_v44, %v345_v43  ;;  %v449_v22 = vsub.f32 %v809_v30, %v793_v15  ;;  %v319_v30 = vsub.f32 %v793_v15, %v250_v63 }
 0x12c   :  { %v218_v20 = vpop.f32.mrf.mxu0  ;;  %v339_v19 = vmax.f32 %v323_v0, 0.0 }
 0x12d   :  { %v801_v21 = vadd.f32 %v218_v20, %v189_v57  ;;  %v507_v54 = vmul.f32 %v491_v42, %v491_v42  ;;  %v471_v57 = vmax.f32 %v455_v40, 0.0  ;;  %v505_v2 = vmul.f32 %v489_v55, %v489_v55 }
 0x12e   :  { %v321_v20 = vsub.f32 %v793_v15, %v795_v16  ;;  %v465_v16 = vmax.f32 %v449_v22, 0.0 }
 0x12f   :  { %v332_v26 = vsub.f32 %v801_v21, %v315_v58  ;;  %v460_v27 = vsub.f32 %v443_v53, %v801_v21  ;;  %v330_v28 = vsub.f32 %v801_v21, %v305_v60  ;;  %v458_v29 = vsub.f32 %v433_v62, %v801_v21 }
 0x130   :  { %v328_v31 = vsub.f32 %v801_v21, %v295_v1  ;;  %v456_v32 = vsub.f32 %v423_v3, %v801_v21  ;;  %v326_v45 = vsub.f32 %v801_v21, %v285_v6  ;;  %v454_v46 = vsub.f32 %v413_v5, %v801_v21  ;;  %v245_v6 = vpop.permute.xlu1 %244  ;;  %v240_v42 = vpop.permute.xlu0 %239 }
 0x131   :  { %v348_v33 = vmax.f32 %v332_v26, 0.0  ;;  %v476_v34 = vmax.f32 %v460_v27, 0.0  ;;  %v346_v35 = vmax.f32 %v330_v28, 0.0  ;;  %v474_v36 = vmax.f32 %v458_v29, 0.0 }
 0x132   :  { %v344_v49 = vmax.f32 %v328_v31, 0.0  ;;  %v472_v50 = vmax.f32 %v456_v32, 0.0  ;;  %v342_v53 = vmax.f32 %v326_v45, 0.0  ;;  %v470_v58 = vmax.f32 %v454_v46, 0.0 }
 0x133   :  { %v492_v41 = vmul.f32 %v476_v34, %v348_v33  ;;  %v490_v48 = vmul.f32 %v474_v36, %v346_v35  ;;  %v324_v59 = vsub.f32 %v801_v21, %v781_v8  ;;  %v452_v60 = vsub.f32 %v785_v10, %v801_v21  ;;  %v373_v34 = vpop.permute.xlu2 %372 }
 0x134   :  { %v488_v62 = vmul.f32 %v472_v50, %v344_v49  ;;  %v451_v1 = vsub.f32 %v787_v11, %v793_v15  ;;  %v487_v3 = vmul.f32 %v471_v57, %v343_v56  ;;  %v469_v5 = vmax.f32 %v453_v52, 0.0 }
 0x135   :  { %v508_v47 = vmul.f32 %v492_v41, %v492_v41  ;;  %v506_v61 = vmul.f32 %v490_v48, %v490_v48  ;;  %v486_v8 = vmul.f32 %v470_v58, %v342_v53  ;;  %v340_v9 = vmax.f32 %v324_v59, 0.0 }
 0x136   :  { %v468_v10 = vmax.f32 %v452_v60, 0.0  ;;  %v504_v13 = vmul.f32 %v488_v62, %v488_v62  ;;  %v322_v18 = vsub.f32 %v801_v21, %v791_v14  ;;  %v450_v12 = vsub.f32 %v797_v17, %v801_v21 }
 0x137   :  { %516 = vmatpush.msra.mxu1 %v508_v47  ;;  %v467_v11 = vmax.f32 %v451_v1, 0.0  ;;  %v503_v23 = vmul.f32 %v487_v3, %v487_v3  ;;  %v485_v24 = vmul.f32 %v469_v5, %v341_v4  ;;  %v502_v25 = vmul.f32 %v486_v8, %v486_v8 }
 0x138   :  { %v484_v26 = vmul.f32 %v468_v10, %v340_v9  ;;  %v338_v27 = vmax.f32 %v322_v18, 0.0  ;;  %v466_v28 = vmax.f32 %v450_v12, 0.0  ;;  %v320_v14 = vsub.f32 %v801_v21, %v815_v38 }
 0x139   :  { %517 = vmatpush.msra.mxu1 %v507_v54  ;;  %v448_v17 = vsub.f32 %v813_v37, %v801_v21  ;;  %v483_v29 = vmul.f32 %v467_v11, %v339_v19  ;;  %v337_v31 = vmax.f32 %v321_v20, 0.0  ;;  %v501_v32 = vmul.f32 %v485_v24, %v485_v24  ;;  %v368_v37 = vpop.permute.xlu1 %367 }
 0x13a   :  { %v447_v33 = vsub.f32 %v378_v7, %v793_v15  ;;  %v500_v35 = vmul.f32 %v484_v26, %v484_v26  ;;  %v318_v36 = vsub.f32 %v801_v21, %v245_v6  ;;  %v482_v39 = vmul.f32 %v466_v28, %v338_v27 }
 0x13b   :  { %518 = vmatpush.msra.mxu1 %v506_v61  ;;  %v336_v40 = vmax.f32 %v320_v14, 0.0  ;;  %v464_v38 = vmax.f32 %v448_v17, 0.0  ;;  %v446_v41 = vsub.f32 %v373_v34, %v801_v21  ;;  %v499_v43 = vmul.f32 %v483_v29, %v483_v29  ;;  %v509_v61 = vld [vmem:[%s865_s7] sm:$0xff]  ;;  %v514_v62 = vpop.permute.xlu2 %513 }
 0x13c   :  { %v481_v44 = vmul.f32 %v465_v16, %v337_v31  ;;  %v335_v45 = vmax.f32 %v319_v30, 0.0  ;;  %v463_v46 = vmax.f32 %v447_v33, 0.0  ;;  %v317_v47 = vsub.f32 %v793_v15, %v240_v42 }
 0x13d   :  { %519 = vmatpush.msra.mxu1 %v505_v2  ;;  %v445_v48 = vsub.f32 %v368_v37, %v793_v15  ;;  %v498_v49 = vmul.f32 %v482_v39, %v482_v39  ;;  %v480_v50 = vmul.f32 %v464_v38, %v336_v40  ;;  %v334_v51 = vmax.f32 %v318_v36, 0.0 }
 0x13e   :  { %v462_v52 = vmax.f32 %v446_v41, 0.0  ;;  %v497_v54 = vmul.f32 %v481_v44, %v481_v44  ;;  %v479_v55 = vmul.f32 %v463_v46, %v335_v45  ;;  %v333_v21 = vmax.f32 %v317_v47, 0.0 }
 0x13f   :  { %520 = vmatpush.msra.mxu1 %v504_v13  ;;  %v461_v56 = vmax.f32 %v445_v48, 0.0  ;;  %v496_v57 = vmul.f32 %v480_v50, %v480_v50 }
 0x140   :  { %v478_v53 = vmul.f32 %v462_v52, %v334_v51  ;;  %v495_v58 = vmul.f32 %v479_v55, %v479_v55 }
 0x141   :  { %521 = vmatpush.msra.mxu1 %v503_v23  ;;  %v477_v59 = vmul.f32 %v461_v56, %v333_v21 }
 0x142   :  { %v494_v60 = vmul.f32 %v478_v53, %v478_v53 }
 0x143   :  { %522 = vmatpush.msra.mxu1 %v502_v25  ;;  %v493_v15 = vmul.f32 %v477_v59, %v477_v59 }
 0x145   :  { %523 = vmatpush.msra.mxu1 %v501_v32 }
 0x147   :  { %524 = vmatpush.msra.mxu1 %v500_v35 }
 0x149   :  { %525 = vmatpush.msra.mxu1 %v499_v43 }
 0x14b   :  { %526 = vmatpush.msra.mxu1 %v498_v49 }
 0x14d   :  { %527 = vmatpush.msra.mxu1 %v497_v54 }
 0x14f   :  { %528 = vmatpush.msra.mxu1 %v496_v57 }
 0x151   :  { %529 = vmatpush.msra.mxu1 %v495_v58 }
 0x153   :  { %530 = vmatpush.msra.mxu1 %v494_v60 }
 0x155   :  { %531 = vmatpush.msra.mxu1 %v493_v15 }
 0x156   :  { %532 = vmatmul.f32.vlgmr.msra.gmra.mxu1 %v509_v61 }
 0x1d3   :  { %v533_v63 = vpop.f32.mrf.mxu1 }
 0x1d4   :  { %v534_v0 = vadd.f32 %v533_v63, %v514_v62 }
 0x1d6   :  { %537 = vst.msk [vmem:[%s866_s9] sm:$0xff] %vm536_vm1, %v534_v0 }

</bundles_post_ra>
